<compile_context>
chip_gen: v5e
topology: v5e:2x2
jax: 0.10.0
libtpu: 0.0.40
codegen_flags: <defaults>
</compile_context>

<pallas_src>
import numpy as np
import jax
import jax.numpy as jnp
from jax import lax
from jax.experimental import pallas as pl
from jax.experimental.pallas import tpu as pltpu

ROWS = 24          # 17 used rows padded to a multiple of 8 sublanes
OUT_ROWS = 8
LANES_MIN = 128
LANE_BLOCK = 512   # lanes per grid step when the pair count is large

EPS_PD = 1e-6      # torch.nn.PairwiseDistance default eps (added to the difference)
DISTAL_MIN_DISTANCE = 3.0
PROXIMAL_MIN_DISTANCE = 1.0
PROXIMAL_MAX_DISTANCE = 2.5
EXTERIOR_EPS = 0.01
ANGLE_PENALTY = 1.5
DISTANCE_PENALTY = 1.0

# get_face_centers order: -x, -y, +x, +y, -z, +z.  Each face perturbs exactly one
# coordinate of the box center: (coordinate index, sign).
FACES = ((0, -1.0), (1, -1.0), (0, 1.0), (1, 1.0), (2, -1.0), (2, 1.0))

# packed-row layout of the single input slab
_R_TC, _R_TS, _R_RC, _R_RS, _R_DV, _R_DT, _R_VALID = 0, 3, 6, 9, 12, 15, 16


def _in_region_penalty_kernel(p_ref, out_ref):
    def row(r):
        return p_ref[r:r + 1, :]                     # (1, L) lane-parallel row

    tc = [row(_R_TC + k) for k in range(3)]          # target center
    ts = [row(_R_TS + k) for k in range(3)]          # target scale diag
    rc = [row(_R_RC + k) for k in range(3)]          # reference center
    rs = [row(_R_RS + k) for k in range(3)]          # reference scale diag
    dv = [row(_R_DV + k) for k in range(3)]          # region direction vector
    dt = row(_R_DT)                                  # distance type 0/1/2
    valid = row(_R_VALID)                            # 1.0 for real pairs

    # ---- reference_box.nearest_center_face_point(target_center) -------------
    # argmin over squared PairwiseDistance (sqrt is monotone); strict "<" keeps
    # the first-min tie-break of torch.argmin.  Only the perturbed coordinate's
    # squared term changes per face.
    diff = [rc[k] - tc[k] + EPS_PD for k in range(3)]
    dsq = [d * d for d in diff]
    base = dsq[0] + dsq[1] + dsq[2]
    best_d2 = jnp.full_like(base, jnp.inf)
    bfc = [rc[0], rc[1], rc[2]]                      # chosen face center, per coordinate
    for k, s in FACES:
        pert = diff[k] + s * rs[k]                   # (fc_k - tc_k + eps)
        d2 = base - dsq[k] + pert * pert
        pick = d2 < best_d2
        best_d2 = jnp.where(pick, d2, best_d2)
        for j in range(3):
            cand = rc[j] + s * rs[j] if j == k else rc[j]
            bfc[j] = jnp.where(pick, cand, bfc[j])

    cur = [tc[j] - bfc[j] for j in range(3)]         # current direction reference -> target

    # ---- cos(angle_between(direction_vector, current_direction)) ------------
    n0sq = dv[0] * dv[0] + dv[1] * dv[1] + dv[2] * dv[2]
    n1sq = cur[0] * cur[0] + cur[1] * cur[1] + cur[2] * cur[2]
    dot = dv[0] * cur[0] + dv[1] * cur[1] + dv[2] * cur[2]
    cos_raw = dot * lax.rsqrt(n0sq * n1sq)           # EUP rsqrt; no full-tile divides
    zero_vec = (n0sq == 0.0) | (n1sq == 0.0)         # angle_between returns None -> angle 0
    # zero vectors and NaN cosines map to cos=1 -> arccos gives exactly 0 later
    cos_eff = jnp.where(zero_vec | jnp.isnan(cos_raw), 1.0, cos_raw)

    # ---- target_box.nearest_center_face_distance_from_point(ref_center) -----
    tdiff = [tc[k] - rc[k] + EPS_PD for k in range(3)]
    tsq = [d * d for d in tdiff]
    tbase = tsq[0] + tsq[1] + tsq[2]
    min_d2 = jnp.full_like(tbase, jnp.inf)
    for k, s in FACES:
        pert = tdiff[k] + s * ts[k]
        min_d2 = jnp.minimum(min_d2, tbase - tsq[k] + pert * pert)
    dist = jnp.sqrt(min_d2)                          # single sqrt after the min

    # ---- distance penalty by region.distance ---------------------------------
    dp_distal = jnp.maximum(DISTAL_MIN_DISTANCE - dist, 0.0)
    dp_prox = (jnp.maximum(PROXIMAL_MIN_DISTANCE - dist, 0.0)
               + jnp.maximum(dist - PROXIMAL_MAX_DISTANCE, 0.0))
    dp_ext = jnp.where(dist > EXTERIOR_EPS, dist * 1.5, 0.0)
    dp = jnp.where(dt == 0.0, dp_distal, jnp.where(dt == 1.0, dp_prox, dp_ext)) * valid

    # direct row stores (no iota / full-tile selects)
    out_ref[0:1, :] = cos_eff
    out_ref[1:2, :] = dp
    out_ref[2:, :] = jnp.zeros((OUT_ROWS - 2, out_ref.shape[1]), jnp.float32)


def _pad_lanes(n):
    if n <= LANE_BLOCK:
        return max(LANES_MIN, -(-n // LANES_MIN) * LANES_MIN)
    return -(-n // LANE_BLOCK) * LANE_BLOCK


def _pairwise_cos_and_dp(tc, ts, rc, rs, dv, dt):
    """Per-pair cos(angle) and distance penalty for N flattened pairs ((N,3)/(N,) inputs)."""
    n = rc.shape[0]
    n_pad = _pad_lanes(n)
    rows = jnp.concatenate([
        jnp.asarray(tc, jnp.float32).T, jnp.asarray(ts, jnp.float32).T,
        jnp.asarray(rc, jnp.float32).T, jnp.asarray(rs, jnp.float32).T,
        jnp.asarray(dv, jnp.float32).T,
        jnp.asarray(dt, jnp.float32)[None, :],
        jnp.ones((1, n), jnp.float32),               # valid flag
    ], axis=0)                                       # (17, N)
    packed = jnp.pad(rows, ((0, ROWS - rows.shape[0]), (0, n_pad - n)))

    out_shape = jax.ShapeDtypeStruct((OUT_ROWS, n_pad), jnp.float32)
    if n_pad <= LANE_BLOCK:
        # Small pair counts: whole-array VMEM blocks, no grid (no pipeline overhead).
        out = pl.pallas_call(
            _in_region_penalty_kernel,
            out_shape=out_shape,
            in_specs=[pl.BlockSpec(memory_space=pltpu.MemorySpace.VMEM)],
            out_specs=pl.BlockSpec(memory_space=pltpu.MemorySpace.VMEM),
        )(packed)
    else:
        # Large batches: lane-chunked grid; "parallel" lets v7x split chunks across its 2 TCs.
        out = pl.pallas_call(
            _in_region_penalty_kernel,
            out_shape=out_shape,
            grid=(n_pad // LANE_BLOCK,),
            in_specs=[pl.BlockSpec((ROWS, LANE_BLOCK), lambda i: (0, i))],
            out_specs=pl.BlockSpec((OUT_ROWS, LANE_BLOCK), lambda i: (0, i)),
            compiler_params=pltpu.CompilerParams(dimension_semantics=("parallel",)),
        )(packed)
    return out[0, :n], out[1, :n]


def _per_pair_penalty(cos_eff, dp):
    # TODO(synk): arccos + the torch.allclose(pi) branch stay in this fused jit epilogue;
    # Mosaic transcendental coverage for acos is not guaranteed. All geometry,
    # argmin/min selection and the distance penalties run inside the Pallas kernel.
    angle = jnp.arccos(cos_eff)                      # NaN for |cos|>1, matching torch
    angle = jnp.where(jnp.isnan(angle), 0.0, angle)  # mirrors `torch.isnan(angle)` handling
    pi = jnp.float32(np.pi)
    is_pi = (angle != 0.0) & (jnp.abs(angle - pi) <= (1e-8 + 1e-5 * pi))  # torch.allclose defaults
    return jnp.where(is_pi, dp * DISTANCE_PENALTY,
                     angle * ANGLE_PENALTY + dp * DISTANCE_PENALTY)


@jax.jit
def _in_region_penalty_single(tc, ts, rc, rs, dv, dt):
    n = rc.shape[0]
    cos_eff, dp = _pairwise_cos_and_dp(
        jnp.broadcast_to(tc[None, :], (n, 3)), jnp.broadcast_to(ts[None, :], (n, 3)),
        rc, rs, dv, dt)
    return jnp.sum(_per_pair_penalty(cos_eff, dp)).reshape(1)


def in_region_penalty(target_center, target_scale_diag, ref_centers, ref_scale_diags,
                      direction_vectors, distance_types):
    """InRegionPenalty.forward for one target box over its designated regions -> (1,)."""
    if int(ref_centers.shape[0]) == 0:               # "if not designated_region"
        return jnp.zeros((1,), jnp.float32)
    return _in_region_penalty_single(
        jnp.asarray(target_center, jnp.float32), jnp.asarray(target_scale_diag, jnp.float32),
        jnp.asarray(ref_centers, jnp.float32), jnp.asarray(ref_scale_diags, jnp.float32),
        jnp.asarray(direction_vectors, jnp.float32),
        jnp.asarray(distance_types, jnp.float32))


@jax.jit
def in_region_penalty_batched(target_centers, target_scales, ref_centers, ref_scales,
                              direction_vectors, distance_types):
    """Batched forward: B targets x R regions -> (B,) per-target penalties in one kernel call."""
    B, R = ref_centers.shape[:2]
    cos_eff, dp = _pairwise_cos_and_dp(
        jnp.broadcast_to(target_centers[:, None, :], (B, R, 3)).reshape(B * R, 3),
        jnp.broadcast_to(target_scales[:, None, :], (B, R, 3)).reshape(B * R, 3),
        ref_centers.reshape(B * R, 3), ref_scales.reshape(B * R, 3),
        direction_vectors.reshape(B * R, 3),
        distance_types.reshape(B * R).astype(jnp.float32))
    return _per_pair_penalty(cos_eff, dp).reshape(B, R).sum(axis=1)


# --------------------------- numpy reference (verification) ---------------------------
_FACE_SIGNS = np.array(
    [[-1.0, 0.0, 0.0], [0.0, -1.0, 0.0], [1.0, 0.0, 0.0],
     [0.0, 1.0, 0.0], [0.0, 0.0, -1.0], [0.0, 0.0, 1.0]], dtype=np.float64)


def _reference(target_center, target_scale_diag, ref_centers, ref_scale_diags,
               direction_vectors, distance_types):
    """Pure numpy re-implementation of InRegionPenalty.forward for a single target."""
    tc = np.asarray(target_center, np.float64)
    ts = np.asarray(target_scale_diag, np.float64)
    total = 0.0
    for i in range(ref_centers.shape[0]):
        rc = np.asarray(ref_centers[i], np.float64)
        rs = np.asarray(ref_scale_diags[i], np.float64)
        dv = np.asarray(direction_vectors[i], np.float64)
        rfc = rc[None, :] + _FACE_SIGNS * rs[None, :]
        d = np.linalg.norm(rfc - tc[None, :] + EPS_PD, axis=1)
        nearest = rfc[int(np.argmin(d))]
        cur = tc - nearest
        if np.all(dv == 0.0) or np.all(cur == 0.0):
            angle = 0.0
        else:
            c = float(np.dot(dv / np.linalg.norm(dv), cur / np.linalg.norm(cur)))
            angle = float(np.arccos(c))
            if np.isnan(angle):
                angle = 0.0
        tfc = tc[None, :] + _FACE_SIGNS * ts[None, :]
        dist = float(np.min(np.linalg.norm(tfc - rc[None, :] + EPS_PD, axis=1)))
        t = int(distance_types[i])
        if t == 0:      # DISTAL
            dpen = DISTAL_MIN_DISTANCE - dist if dist < DISTAL_MIN_DISTANCE else 0.0
        elif t == 1:    # PROXIMAL
            if PROXIMAL_MIN_DISTANCE <= dist <= PROXIMAL_MAX_DISTANCE:
                dpen = 0.0
            elif dist < PROXIMAL_MIN_DISTANCE:
                dpen = PROXIMAL_MIN_DISTANCE - dist
            else:
                dpen = dist - PROXIMAL_MAX_DISTANCE
        else:           # EXTERIOR_BUT_IN_CONTACT
            dpen = dist * 1.5 if dist > EXTERIOR_EPS else 0.0
        if angle != 0.0 and abs(angle - np.pi) <= 1e-8 + 1e-5 * np.pi:
            total += dpen * DISTANCE_PENALTY
        else:
            total += angle * ANGLE_PENALTY + dpen * DISTANCE_PENALTY
    return np.float32(total)


if __name__ == "__main__":
    key = jax.random.PRNGKey(0)
    k1, k2, k3, k4 = jax.random.split(key, 4)

    # --- single target with 4 designated regions (matches the module's forward) ---
    n_regions = 4
    target_center = jax.random.normal(k1, (3,), jnp.float32) * 2.0
    target_scale = jax.random.uniform(k2, (3,), jnp.float32, 0.5, 1.5)
    ref_centers = jax.random.normal(k3, (n_regions, 3), jnp.float32) * 3.0
    ref_scales = jax.random.uniform(k4, (n_regions, 3), jnp.float32, 0.5, 2.0)
    # Directions as produced by direction_as_unit_vector: grav-up, +x axis, grav-down, None
    direction_vectors = jnp.array([[0.0, 0.0, 1.0],
                                   [1.0, 0.0, 0.0],
                                   [0.0, 0.0, -1.0],
                                   [0.0, 0.0, 0.0]], jnp.float32)
    distance_types = jnp.array([0, 1, 2, 1], jnp.int32)  # DISTAL, PROXIMAL, EXTERIOR, PROXIMAL

    result = jax.block_until_ready(in_region_penalty(
        target_center, target_scale, ref_centers, ref_scales,
        direction_vectors, distance_types))
    expected = _reference(np.asarray(target_center), np.asarray(target_scale),
                          np.asarray(ref_centers), np.asarray(ref_scales),
                          np.asarray(direction_vectors), np.asarray(distance_types))
    np.testing.assert_allclose(np.asarray(result)[0], expected, rtol=2e-4, atol=2e-4)

    # --- batched: 4 targets x 160 regions each (exercises the lane-chunked, parallel grid path) ---
    B, R = 4, 160
    kb = jax.random.split(jax.random.PRNGKey(1), 6)
    tcs = jax.random.normal(kb[0], (B, 3), jnp.float32) * 2.0
    tss = jax.random.uniform(kb[1], (B, 3), jnp.float32, 0.5, 1.5)
    rcs = jax.random.normal(kb[2], (B, R, 3), jnp.float32) * 3.0
    rss = jax.random.uniform(kb[3], (B, R, 3), jnp.float32, 0.5, 2.0)
    dir_candidates = jnp.array([[0.0, 0.0, 1.0], [0.0, 0.0, -1.0],
                                [1.0, 0.0, 0.0], [-1.0, 0.0, 0.0],
                                [0.0, 0.0, 0.0]], jnp.float32)
    dir_idx = jax.random.randint(kb[4], (B, R), 0, dir_candidates.shape[0])
    dvs = dir_candidates[dir_idx]
    dts = jax.random.randint(kb[5], (B, R), 0, 3)

    batched = jax.block_until_ready(
        in_region_penalty_batched(tcs, tss, rcs, rss, dvs, dts))
    for b in range(B):
        exp_b = _reference(np.asarray(tcs[b]), np.asarray(tss[b]), np.asarray(rcs[b]),
                           np.asarray(rss[b]), np.asarray(dvs[b]), np.asarray(dts[b]))
        np.testing.assert_allclose(np.asarray(batched)[b], exp_b, rtol=1e-3, atol=1e-3)

    print("KERNEL_OK")
</pallas_src>

<mosaic_0001>
module attributes {stable_mosaic.version = 11 : i64} {
  func.func @_in_region_penalty_kernel(%arg0: memref<24x128xf32, #tpu.memory_space<vmem>>, %arg1: memref<8x128xf32, #tpu.memory_space<vmem>>) attributes {dimension_semantics = [], scalar_prefetch = 0 : i64, scratch_operands = 0 : i64, tpu.core_type = #tpu.core_type<tc>} {
    %c0 = arith.constant 0 : index
    %c0_0 = arith.constant 0 : index
    %0 = vector.load %arg0[%c0, %c0_0] : memref<24x128xf32, #tpu.memory_space<vmem>>, vector<1x128xf32>
    %c1 = arith.constant 1 : index
    %c0_1 = arith.constant 0 : index
    %1 = vector.load %arg0[%c1, %c0_1] : memref<24x128xf32, #tpu.memory_space<vmem>>, vector<1x128xf32>
    %c2 = arith.constant 2 : index
    %c0_2 = arith.constant 0 : index
    %2 = vector.load %arg0[%c2, %c0_2] : memref<24x128xf32, #tpu.memory_space<vmem>>, vector<1x128xf32>
    %c3 = arith.constant 3 : index
    %c0_3 = arith.constant 0 : index
    %3 = vector.load %arg0[%c3, %c0_3] : memref<24x128xf32, #tpu.memory_space<vmem>>, vector<1x128xf32>
    %c4 = arith.constant 4 : index
    %c0_4 = arith.constant 0 : index
    %4 = vector.load %arg0[%c4, %c0_4] : memref<24x128xf32, #tpu.memory_space<vmem>>, vector<1x128xf32>
    %c5 = arith.constant 5 : index
    %c0_5 = arith.constant 0 : index
    %5 = vector.load %arg0[%c5, %c0_5] : memref<24x128xf32, #tpu.memory_space<vmem>>, vector<1x128xf32>
    %c6 = arith.constant 6 : index
    %c0_6 = arith.constant 0 : index
    %6 = vector.load %arg0[%c6, %c0_6] : memref<24x128xf32, #tpu.memory_space<vmem>>, vector<1x128xf32>
    %c7 = arith.constant 7 : index
    %c0_7 = arith.constant 0 : index
    %7 = vector.load %arg0[%c7, %c0_7] : memref<24x128xf32, #tpu.memory_space<vmem>>, vector<1x128xf32>
    %c8 = arith.constant 8 : index
    %c0_8 = arith.constant 0 : index
    %8 = vector.load %arg0[%c8, %c0_8] : memref<24x128xf32, #tpu.memory_space<vmem>>, vector<1x128xf32>
    %c9 = arith.constant 9 : index
    %c0_9 = arith.constant 0 : index
    %9 = vector.load %arg0[%c9, %c0_9] : memref<24x128xf32, #tpu.memory_space<vmem>>, vector<1x128xf32>
    %c10 = arith.constant 10 : index
    %c0_10 = arith.constant 0 : index
    %10 = vector.load %arg0[%c10, %c0_10] : memref<24x128xf32, #tpu.memory_space<vmem>>, vector<1x128xf32>
    %c11 = arith.constant 11 : index
    %c0_11 = arith.constant 0 : index
    %11 = vector.load %arg0[%c11, %c0_11] : memref<24x128xf32, #tpu.memory_space<vmem>>, vector<1x128xf32>
    %c12 = arith.constant 12 : index
    %c0_12 = arith.constant 0 : index
    %12 = vector.load %arg0[%c12, %c0_12] : memref<24x128xf32, #tpu.memory_space<vmem>>, vector<1x128xf32>
    %c13 = arith.constant 13 : index
    %c0_13 = arith.constant 0 : index
    %13 = vector.load %arg0[%c13, %c0_13] : memref<24x128xf32, #tpu.memory_space<vmem>>, vector<1x128xf32>
    %c14 = arith.constant 14 : index
    %c0_14 = arith.constant 0 : index
    %14 = vector.load %arg0[%c14, %c0_14] : memref<24x128xf32, #tpu.memory_space<vmem>>, vector<1x128xf32>
    %c15 = arith.constant 15 : index
    %c0_15 = arith.constant 0 : index
    %15 = vector.load %arg0[%c15, %c0_15] : memref<24x128xf32, #tpu.memory_space<vmem>>, vector<1x128xf32>
    %c16 = arith.constant 16 : index
    %c0_16 = arith.constant 0 : index
    %16 = vector.load %arg0[%c16, %c0_16] : memref<24x128xf32, #tpu.memory_space<vmem>>, vector<1x128xf32>
    %17 = arith.subf %6, %0 : vector<1x128xf32>
    %cst = arith.constant 9.99999997E-7 : f32
    %18 = vector.broadcast %cst : f32 to vector<1x128xf32>
    %19 = arith.addf %17, %18 : vector<1x128xf32>
    %20 = arith.subf %7, %1 : vector<1x128xf32>
    %cst_17 = arith.constant 9.99999997E-7 : f32
    %21 = vector.broadcast %cst_17 : f32 to vector<1x128xf32>
    %22 = arith.addf %20, %21 : vector<1x128xf32>
    %23 = arith.subf %8, %2 : vector<1x128xf32>
    %cst_18 = arith.constant 9.99999997E-7 : f32
    %24 = vector.broadcast %cst_18 : f32 to vector<1x128xf32>
    %25 = arith.addf %23, %24 : vector<1x128xf32>
    %26 = arith.mulf %19, %19 : vector<1x128xf32>
    %27 = arith.mulf %22, %22 : vector<1x128xf32>
    %28 = arith.mulf %25, %25 : vector<1x128xf32>
    %29 = arith.addf %26, %27 : vector<1x128xf32>
    %30 = arith.addf %29, %28 : vector<1x128xf32>
    %cst_19 = arith.constant 0x7F800000 : f32
    %31 = vector.broadcast %cst_19 : f32 to vector<1x128xf32>
    %cst_20 = arith.constant -1.000000e+00 : f32
    %32 = vector.broadcast %cst_20 : f32 to vector<1x128xf32>
    %33 = arith.mulf %32, %9 : vector<1x128xf32>
    %34 = arith.addf %19, %33 : vector<1x128xf32>
    %35 = arith.subf %30, %26 : vector<1x128xf32>
    %36 = arith.mulf %34, %34 : vector<1x128xf32>
    %37 = arith.addf %35, %36 : vector<1x128xf32>
    %38 = arith.cmpf olt, %37, %31 : vector<1x128xf32>
    %39 = arith.select %38, %37, %31 : vector<1x128xi1>, vector<1x128xf32>
    %cst_21 = arith.constant -1.000000e+00 : f32
    %40 = vector.broadcast %cst_21 : f32 to vector<1x128xf32>
    %41 = arith.mulf %40, %9 : vector<1x128xf32>
    %42 = arith.addf %6, %41 : vector<1x128xf32>
    %43 = arith.select %38, %42, %6 : vector<1x128xi1>, vector<1x128xf32>
    %44 = arith.select %38, %7, %7 : vector<1x128xi1>, vector<1x128xf32>
    %45 = arith.select %38, %8, %8 : vector<1x128xi1>, vector<1x128xf32>
    %cst_22 = arith.constant -1.000000e+00 : f32
    %46 = vector.broadcast %cst_22 : f32 to vector<1x128xf32>
    %47 = arith.mulf %46, %10 : vector<1x128xf32>
    %48 = arith.addf %22, %47 : vector<1x128xf32>
    %49 = arith.subf %30, %27 : vector<1x128xf32>
    %50 = arith.mulf %48, %48 : vector<1x128xf32>
    %51 = arith.addf %49, %50 : vector<1x128xf32>
    %52 = arith.cmpf olt, %51, %39 : vector<1x128xf32>
    %53 = arith.select %52, %51, %39 : vector<1x128xi1>, vector<1x128xf32>
    %54 = arith.select %52, %6, %43 : vector<1x128xi1>, vector<1x128xf32>
    %cst_23 = arith.constant -1.000000e+00 : f32
    %55 = vector.broadcast %cst_23 : f32 to vector<1x128xf32>
    %56 = arith.mulf %55, %10 : vector<1x128xf32>
    %57 = arith.addf %7, %56 : vector<1x128xf32>
    %58 = arith.select %52, %57, %44 : vector<1x128xi1>, vector<1x128xf32>
    %59 = arith.select %52, %8, %45 : vector<1x128xi1>, vector<1x128xf32>
    %cst_24 = arith.constant 1.000000e+00 : f32
    %60 = vector.broadcast %cst_24 : f32 to vector<1x128xf32>
    %61 = arith.mulf %60, %9 : vector<1x128xf32>
    %62 = arith.addf %19, %61 : vector<1x128xf32>
    %63 = arith.subf %30, %26 : vector<1x128xf32>
    %64 = arith.mulf %62, %62 : vector<1x128xf32>
    %65 = arith.addf %63, %64 : vector<1x128xf32>
    %66 = arith.cmpf olt, %65, %53 : vector<1x128xf32>
    %67 = arith.select %66, %65, %53 : vector<1x128xi1>, vector<1x128xf32>
    %cst_25 = arith.constant 1.000000e+00 : f32
    %68 = vector.broadcast %cst_25 : f32 to vector<1x128xf32>
    %69 = arith.mulf %68, %9 : vector<1x128xf32>
    %70 = arith.addf %6, %69 : vector<1x128xf32>
    %71 = arith.select %66, %70, %54 : vector<1x128xi1>, vector<1x128xf32>
    %72 = arith.select %66, %7, %58 : vector<1x128xi1>, vector<1x128xf32>
    %73 = arith.select %66, %8, %59 : vector<1x128xi1>, vector<1x128xf32>
    %cst_26 = arith.constant 1.000000e+00 : f32
    %74 = vector.broadcast %cst_26 : f32 to vector<1x128xf32>
    %75 = arith.mulf %74, %10 : vector<1x128xf32>
    %76 = arith.addf %22, %75 : vector<1x128xf32>
    %77 = arith.subf %30, %27 : vector<1x128xf32>
    %78 = arith.mulf %76, %76 : vector<1x128xf32>
    %79 = arith.addf %77, %78 : vector<1x128xf32>
    %80 = arith.cmpf olt, %79, %67 : vector<1x128xf32>
    %81 = arith.select %80, %79, %67 : vector<1x128xi1>, vector<1x128xf32>
    %82 = arith.select %80, %6, %71 : vector<1x128xi1>, vector<1x128xf32>
    %cst_27 = arith.constant 1.000000e+00 : f32
    %83 = vector.broadcast %cst_27 : f32 to vector<1x128xf32>
    %84 = arith.mulf %83, %10 : vector<1x128xf32>
    %85 = arith.addf %7, %84 : vector<1x128xf32>
    %86 = arith.select %80, %85, %72 : vector<1x128xi1>, vector<1x128xf32>
    %87 = arith.select %80, %8, %73 : vector<1x128xi1>, vector<1x128xf32>
    %cst_28 = arith.constant -1.000000e+00 : f32
    %88 = vector.broadcast %cst_28 : f32 to vector<1x128xf32>
    %89 = arith.mulf %88, %11 : vector<1x128xf32>
    %90 = arith.addf %25, %89 : vector<1x128xf32>
    %91 = arith.subf %30, %28 : vector<1x128xf32>
    %92 = arith.mulf %90, %90 : vector<1x128xf32>
    %93 = arith.addf %91, %92 : vector<1x128xf32>
    %94 = arith.cmpf olt, %93, %81 : vector<1x128xf32>
    %95 = arith.select %94, %93, %81 : vector<1x128xi1>, vector<1x128xf32>
    %96 = arith.select %94, %6, %82 : vector<1x128xi1>, vector<1x128xf32>
    %97 = arith.select %94, %7, %86 : vector<1x128xi1>, vector<1x128xf32>
    %cst_29 = arith.constant -1.000000e+00 : f32
    %98 = vector.broadcast %cst_29 : f32 to vector<1x128xf32>
    %99 = arith.mulf %98, %11 : vector<1x128xf32>
    %100 = arith.addf %8, %99 : vector<1x128xf32>
    %101 = arith.select %94, %100, %87 : vector<1x128xi1>, vector<1x128xf32>
    %cst_30 = arith.constant 1.000000e+00 : f32
    %102 = vector.broadcast %cst_30 : f32 to vector<1x128xf32>
    %103 = arith.mulf %102, %11 : vector<1x128xf32>
    %104 = arith.addf %25, %103 : vector<1x128xf32>
    %105 = arith.subf %30, %28 : vector<1x128xf32>
    %106 = arith.mulf %104, %104 : vector<1x128xf32>
    %107 = arith.addf %105, %106 : vector<1x128xf32>
    %108 = arith.cmpf olt, %107, %95 : vector<1x128xf32>
    %109 = arith.select %108, %6, %96 : vector<1x128xi1>, vector<1x128xf32>
    %110 = arith.select %108, %7, %97 : vector<1x128xi1>, vector<1x128xf32>
    %cst_31 = arith.constant 1.000000e+00 : f32
    %111 = vector.broadcast %cst_31 : f32 to vector<1x128xf32>
    %112 = arith.mulf %111, %11 : vector<1x128xf32>
    %113 = arith.addf %8, %112 : vector<1x128xf32>
    %114 = arith.select %108, %113, %101 : vector<1x128xi1>, vector<1x128xf32>
    %115 = arith.subf %0, %109 : vector<1x128xf32>
    %116 = arith.subf %1, %110 : vector<1x128xf32>
    %117 = arith.subf %2, %114 : vector<1x128xf32>
    %118 = arith.mulf %12, %12 : vector<1x128xf32>
    %119 = arith.mulf %13, %13 : vector<1x128xf32>
    %120 = arith.addf %118, %119 : vector<1x128xf32>
    %121 = arith.mulf %14, %14 : vector<1x128xf32>
    %122 = arith.addf %120, %121 : vector<1x128xf32>
    %123 = arith.mulf %115, %115 : vector<1x128xf32>
    %124 = arith.mulf %116, %116 : vector<1x128xf32>
    %125 = arith.addf %123, %124 : vector<1x128xf32>
    %126 = arith.mulf %117, %117 : vector<1x128xf32>
    %127 = arith.addf %125, %126 : vector<1x128xf32>
    %128 = arith.mulf %12, %115 : vector<1x128xf32>
    %129 = arith.mulf %13, %116 : vector<1x128xf32>
    %130 = arith.addf %128, %129 : vector<1x128xf32>
    %131 = arith.mulf %14, %117 : vector<1x128xf32>
    %132 = arith.addf %130, %131 : vector<1x128xf32>
    %133 = arith.mulf %122, %127 : vector<1x128xf32>
    %134 = math.rsqrt %133 : vector<1x128xf32>
    %135 = arith.mulf %132, %134 : vector<1x128xf32>
    %cst_32 = arith.constant 0.000000e+00 : f32
    %136 = vector.broadcast %cst_32 : f32 to vector<1x128xf32>
    %137 = arith.cmpf oeq, %122, %136 : vector<1x128xf32>
    %cst_33 = arith.constant 0.000000e+00 : f32
    %138 = vector.broadcast %cst_33 : f32 to vector<1x128xf32>
    %139 = arith.cmpf oeq, %127, %138 : vector<1x128xf32>
    %140 = arith.ori %137, %139 : vector<1x128xi1>
    %141 = arith.cmpf one, %135, %135 : vector<1x128xf32>
    %142 = arith.ori %140, %141 : vector<1x128xi1>
    %cst_34 = arith.constant 1.000000e+00 : f32
    %143 = vector.broadcast %cst_34 : f32 to vector<1x128xf32>
    %144 = arith.select %142, %143, %135 : vector<1x128xi1>, vector<1x128xf32>
    %145 = arith.subf %0, %6 : vector<1x128xf32>
    %cst_35 = arith.constant 9.99999997E-7 : f32
    %146 = vector.broadcast %cst_35 : f32 to vector<1x128xf32>
    %147 = arith.addf %145, %146 : vector<1x128xf32>
    %148 = arith.subf %1, %7 : vector<1x128xf32>
    %cst_36 = arith.constant 9.99999997E-7 : f32
    %149 = vector.broadcast %cst_36 : f32 to vector<1x128xf32>
    %150 = arith.addf %148, %149 : vector<1x128xf32>
    %151 = arith.subf %2, %8 : vector<1x128xf32>
    %cst_37 = arith.constant 9.99999997E-7 : f32
    %152 = vector.broadcast %cst_37 : f32 to vector<1x128xf32>
    %153 = arith.addf %151, %152 : vector<1x128xf32>
    %154 = arith.mulf %147, %147 : vector<1x128xf32>
    %155 = arith.mulf %150, %150 : vector<1x128xf32>
    %156 = arith.mulf %153, %153 : vector<1x128xf32>
    %157 = arith.addf %154, %155 : vector<1x128xf32>
    %158 = arith.addf %157, %156 : vector<1x128xf32>
    %cst_38 = arith.constant 0x7F800000 : f32
    %159 = vector.broadcast %cst_38 : f32 to vector<1x128xf32>
    %cst_39 = arith.constant -1.000000e+00 : f32
    %160 = vector.broadcast %cst_39 : f32 to vector<1x128xf32>
    %161 = arith.mulf %160, %3 : vector<1x128xf32>
    %162 = arith.addf %147, %161 : vector<1x128xf32>
    %163 = arith.subf %158, %154 : vector<1x128xf32>
    %164 = arith.mulf %162, %162 : vector<1x128xf32>
    %165 = arith.addf %163, %164 : vector<1x128xf32>
    %166 = arith.minimumf %159, %165 : vector<1x128xf32>
    %cst_40 = arith.constant -1.000000e+00 : f32
    %167 = vector.broadcast %cst_40 : f32 to vector<1x128xf32>
    %168 = arith.mulf %167, %4 : vector<1x128xf32>
    %169 = arith.addf %150, %168 : vector<1x128xf32>
    %170 = arith.subf %158, %155 : vector<1x128xf32>
    %171 = arith.mulf %169, %169 : vector<1x128xf32>
    %172 = arith.addf %170, %171 : vector<1x128xf32>
    %173 = arith.minimumf %166, %172 : vector<1x128xf32>
    %cst_41 = arith.constant 1.000000e+00 : f32
    %174 = vector.broadcast %cst_41 : f32 to vector<1x128xf32>
    %175 = arith.mulf %174, %3 : vector<1x128xf32>
    %176 = arith.addf %147, %175 : vector<1x128xf32>
    %177 = arith.subf %158, %154 : vector<1x128xf32>
    %178 = arith.mulf %176, %176 : vector<1x128xf32>
    %179 = arith.addf %177, %178 : vector<1x128xf32>
    %180 = arith.minimumf %173, %179 : vector<1x128xf32>
    %cst_42 = arith.constant 1.000000e+00 : f32
    %181 = vector.broadcast %cst_42 : f32 to vector<1x128xf32>
    %182 = arith.mulf %181, %4 : vector<1x128xf32>
    %183 = arith.addf %150, %182 : vector<1x128xf32>
    %184 = arith.subf %158, %155 : vector<1x128xf32>
    %185 = arith.mulf %183, %183 : vector<1x128xf32>
    %186 = arith.addf %184, %185 : vector<1x128xf32>
    %187 = arith.minimumf %180, %186 : vector<1x128xf32>
    %cst_43 = arith.constant -1.000000e+00 : f32
    %188 = vector.broadcast %cst_43 : f32 to vector<1x128xf32>
    %189 = arith.mulf %188, %5 : vector<1x128xf32>
    %190 = arith.addf %153, %189 : vector<1x128xf32>
    %191 = arith.subf %158, %156 : vector<1x128xf32>
    %192 = arith.mulf %190, %190 : vector<1x128xf32>
    %193 = arith.addf %191, %192 : vector<1x128xf32>
    %194 = arith.minimumf %187, %193 : vector<1x128xf32>
    %cst_44 = arith.constant 1.000000e+00 : f32
    %195 = vector.broadcast %cst_44 : f32 to vector<1x128xf32>
    %196 = arith.mulf %195, %5 : vector<1x128xf32>
    %197 = arith.addf %153, %196 : vector<1x128xf32>
    %198 = arith.subf %158, %156 : vector<1x128xf32>
    %199 = arith.mulf %197, %197 : vector<1x128xf32>
    %200 = arith.addf %198, %199 : vector<1x128xf32>
    %201 = arith.minimumf %194, %200 : vector<1x128xf32>
    %202 = math.sqrt %201 : vector<1x128xf32>
    %cst_45 = arith.constant 3.000000e+00 : f32
    %203 = vector.broadcast %cst_45 : f32 to vector<1x128xf32>
    %204 = arith.subf %203, %202 : vector<1x128xf32>
    %cst_46 = arith.constant 0.000000e+00 : f32
    %205 = vector.broadcast %cst_46 : f32 to vector<1x128xf32>
    %206 = arith.maximumf %204, %205 : vector<1x128xf32>
    %cst_47 = arith.constant 1.000000e+00 : f32
    %207 = vector.broadcast %cst_47 : f32 to vector<1x128xf32>
    %208 = arith.subf %207, %202 : vector<1x128xf32>
    %cst_48 = arith.constant 0.000000e+00 : f32
    %209 = vector.broadcast %cst_48 : f32 to vector<1x128xf32>
    %210 = arith.maximumf %208, %209 : vector<1x128xf32>
    %cst_49 = arith.constant 2.500000e+00 : f32
    %211 = vector.broadcast %cst_49 : f32 to vector<1x128xf32>
    %212 = arith.subf %202, %211 : vector<1x128xf32>
    %cst_50 = arith.constant 0.000000e+00 : f32
    %213 = vector.broadcast %cst_50 : f32 to vector<1x128xf32>
    %214 = arith.maximumf %212, %213 : vector<1x128xf32>
    %215 = arith.addf %210, %214 : vector<1x128xf32>
    %cst_51 = arith.constant 0.00999999977 : f32
    %216 = vector.broadcast %cst_51 : f32 to vector<1x128xf32>
    %217 = arith.cmpf ogt, %202, %216 : vector<1x128xf32>
    %cst_52 = arith.constant 1.500000e+00 : f32
    %218 = vector.broadcast %cst_52 : f32 to vector<1x128xf32>
    %219 = arith.mulf %202, %218 : vector<1x128xf32>
    %cst_53 = arith.constant 0.000000e+00 : f32
    %220 = vector.broadcast %cst_53 : f32 to vector<1x128xf32>
    %221 = arith.select %217, %219, %220 : vector<1x128xi1>, vector<1x128xf32>
    %cst_54 = arith.constant 0.000000e+00 : f32
    %222 = vector.broadcast %cst_54 : f32 to vector<1x128xf32>
    %223 = arith.cmpf oeq, %15, %222 : vector<1x128xf32>
    %cst_55 = arith.constant 1.000000e+00 : f32
    %224 = vector.broadcast %cst_55 : f32 to vector<1x128xf32>
    %225 = arith.cmpf oeq, %15, %224 : vector<1x128xf32>
    %226 = arith.select %225, %215, %221 : vector<1x128xi1>, vector<1x128xf32>
    %227 = arith.select %223, %206, %226 : vector<1x128xi1>, vector<1x128xf32>
    %228 = arith.mulf %227, %16 : vector<1x128xf32>
    %c0_56 = arith.constant 0 : index
    %c0_57 = arith.constant 0 : index
    %229 = vector.load %arg1[%c0_56, %c0_57] : memref<8x128xf32, #tpu.memory_space<vmem>>, vector<1x128xf32>
    tpu.vector_store %arg1[%c0_56, %c0_57], %144 {strides = array<i32>} : memref<8x128xf32, #tpu.memory_space<vmem>>, vector<1x128xf32>,
    %c1_58 = arith.constant 1 : index
    %c0_59 = arith.constant 0 : index
    %230 = vector.load %arg1[%c1_58, %c0_59] : memref<8x128xf32, #tpu.memory_space<vmem>>, vector<1x128xf32>
    tpu.vector_store %arg1[%c1_58, %c0_59], %228 {strides = array<i32>} : memref<8x128xf32, #tpu.memory_space<vmem>>, vector<1x128xf32>,
    %cst_60 = arith.constant 0.000000e+00 : f32
    %231 = vector.broadcast %cst_60 : f32 to vector<6x128xf32>
    %c2_61 = arith.constant 2 : index
    %c0_62 = arith.constant 0 : index
    %232 = vector.load %arg1[%c2_61, %c0_62] : memref<8x128xf32, #tpu.memory_space<vmem>>, vector<6x128xf32>
    tpu.vector_store %arg1[%c2_61, %c0_62], %231 {strides = array<i32>} : memref<8x128xf32, #tpu.memory_space<vmem>>, vector<6x128xf32>,
    return
  }
}

</mosaic_0001>

<bundles_post_ra>
// kernel: _in_region_penalty_single.1
= control target key start
LH: loop header
LB: loop body
LE: loop exit
PB: predicated region body
PF: predicated region fallthrough
CT: control target
= control target key end

     0   :  { %s353_s0 = inlined_call_operand.vmem [shape: f32[24,128], index: 0, kind: input, shape index: {}]   ;;  %s354_s1 = inlined_call_operand.vmem [shape: f32[8,128], index: 1, kind: output, shape index: {}]  }
   0x1   :  { %v220_v0 = vld [vmem:[%s353_s0] sm:$0x1]  ;;  %v225_v1 = vld [vmem:[%s353_s0 + $0x1] sm:$0x1]  ;;  %v230_v2 = vld [vmem:[%s353_s0 + $0x2] sm:$0x1] }
   0x2   :  { %v235_v3 = vld [vmem:[%s353_s0 + $0x6] sm:$0x1]  ;;  %v240_v4 = vld [vmem:[%s353_s0 + $0x7] sm:$0x1]  ;;  %v245_v5 = vld [vmem:[%s353_s0 + $0x8] sm:$0x1] }
   0x3   :  { %v17_v6 = vld [vmem:[%s353_s0 + $0x9] sm:$0x1]  ;;  %v18_v7 = vld [vmem:[%s353_s0 + $0xa] sm:$0x1]  ;;  %v19_v8 = vld [vmem:[%s353_s0 + $0xb] sm:$0x1]  ;;  %v25_v9 = vsub.f32 %v235_v3, %v220_v0  ;;  %v27_v10 = vsub.f32 %v240_v4, %v225_v1  ;;  %v29_v11 = vsub.f32 %v245_v5, %v230_v2  ;;  %v126_v16 = vsub.f32 %v220_v0, %v235_v3 }
   0x4   :  { %v265_v12 = vld [vmem:[%s353_s0 + $0xc] sm:$0x1]  ;;  %v270_v13 = vld [vmem:[%s353_s0 + $0xd] sm:$0x1]  ;;  %v273_v14 = vadd.f32 %v17_v6, %v235_v3  ;;  %v276_v15 = vadd.f32 %v18_v7, %v240_v4  ;;  %v281_v20 = vadd.f32 %v19_v8, %v245_v5  ;;  %v36_v21 = vmul.f32 -1.0, %v17_v6 }
   0x5   :  { %v26_v17 = vadd.f32 1e-06, %v25_v9  ;;  %v28_v18 = vadd.f32 1e-06, %v27_v10  ;;  %v30_v19 = vadd.f32 1e-06, %v29_v11  ;;  %v128_v24 = vsub.f32 %v225_v1, %v240_v4 }
   0x6   :  { %v45_v22 = vmul.f32 -1.0, %v18_v7  ;;  %v71_v23 = vmul.f32 -1.0, %v19_v8  ;;  %v93_v31 = vmul.f32 %v265_v12, %v265_v12  ;;  %v94_v32 = vmul.f32 %v270_v13, %v270_v13  ;;  %v11_v41 = vld [vmem:[%s353_s0 + $0x3] sm:$0x1]  ;;  %v300_v46 = vld [vmem:[%s353_s0 + $0xe] sm:$0x1] }
   0x7   :  { %v31_v25 = vmul.f32 %v26_v17, %v26_v17  ;;  %v32_v26 = vmul.f32 %v28_v18, %v28_v18  ;;  %v33_v27 = vmul.f32 %v30_v19, %v30_v19  ;;  %v55_v28 = vadd.f32 %v26_v17, %v17_v6  ;;  %v12_v55 = vld [vmem:[%s353_s0 + $0x4] sm:$0x1] }
   0x8   :  { %v37_v29 = vadd.f32 %v36_v21, %v26_v17  ;;  %v46_v30 = vadd.f32 %v45_v22, %v28_v18  ;;  %v43_v34 = vadd.f32 %v36_v21, %v235_v3  ;;  %v63_v35 = vadd.f32 %v28_v18, %v18_v7  ;;  %v13_v17 = vld [vmem:[%s353_s0 + $0x5] sm:$0x1] }
   0x9   :  { %v34_v33 = vadd.f32 %v32_v26, %v31_v25  ;;  %v72_v36 = vadd.f32 %v71_v23, %v30_v19  ;;  %v53_v38 = vadd.f32 %v45_v22, %v240_v4  ;;  %v56_v39 = vmul.f32 %v55_v28, %v55_v28 }
   0xa   :  { %v39_v37 = vmul.f32 %v37_v29, %v37_v29  ;;  %v82_v40 = vadd.f32 %v30_v19, %v19_v8  ;;  %v48_v43 = vmul.f32 %v46_v30, %v46_v30  ;;  %v64_v44 = vmul.f32 %v63_v35, %v63_v35 }
   0xb   :  { %v35_v42 = vadd.f32 %v34_v33, %v33_v27  ;;  %v295_v45 = vadd.f32 %v71_v23, %v245_v5  ;;  %v74_v47 = vmul.f32 %v72_v36, %v72_v36  ;;  %v302_v48 = vadd.f32 %v94_v32, %v93_v31 }
   0xc   :  { %v127_v49 = vadd.f32 1e-06, %v126_v16  ;;  %v129_v50 = vadd.f32 1e-06, %v128_v24  ;;  %v130_v54 = vsub.f32 %v230_v2, %v245_v5  ;;  %v83_v56 = vmul.f32 %v82_v40, %v82_v40 }
   0xd   :  { %v38_v51 = vsub.f32 %v35_v42, %v31_v25  ;;  %v47_v52 = vsub.f32 %v35_v42, %v32_v26  ;;  %v73_v53 = vsub.f32 %v35_v42, %v33_v27  ;;  %v137_v59 = vmul.f32 -1.0, %v11_v41 }
   0xe   :  { %v132_v57 = vmul.f32 %v127_v49, %v127_v49  ;;  %v133_v58 = vmul.f32 %v129_v50, %v129_v50  ;;  %v311_v63 = vmul.f32 %v300_v46, %v300_v46  ;;  %v131_v8 = vadd.f32 1e-06, %v130_v54 }
   0xf   :  { %v40_v60 = vadd.f32 %v39_v37, %v38_v51  ;;  %v49_v61 = vadd.f32 %v48_v43, %v47_v52  ;;  %v57_v62 = vadd.f32 %v56_v39, %v38_v51  ;;  %v65_v6 = vadd.f32 %v64_v44, %v47_v52 }
  0x10   :  { %v75_v7 = vadd.f32 %v74_v47, %v73_v53  ;;  %v135_v9 = vadd.f32 %v133_v58, %v132_v57  ;;  %v138_v10 = vadd.f32 %v137_v59, %v127_v49  ;;  %v142_v11 = vmul.f32 -1.0, %v12_v55 }
  0x11   :  { %vm41_vm0 = vcmp.lt.f32.partialorder %v40_v60, inf  ;;  %v148_v16 = vadd.f32 %v127_v49, %v11_v41  ;;  %v84_v21 = vadd.f32 %v83_v56, %v73_v53  ;;  %v134_v22 = vmul.f32 %v131_v8, %v131_v8 }
  0x12   :  { %v42_v18 = vsel %vm41_vm0, %v40_v60, inf  ;;  %v44_v19 = vsel %vm41_vm0, %v43_v34, %v235_v3  ;;  %v140_v23 = vmul.f32 %v138_v10, %v138_v10  ;;  %v143_v24 = vadd.f32 %v142_v11, %v129_v50 }
  0x13   :  { %vm50_vm1 = vcmp.lt.f32.partialorder %v49_v61, %v42_v18  ;;  %v152_v25 = vadd.f32 %v129_v50, %v12_v55  ;;  %v136_v29 = vadd.f32 %v135_v9, %v134_v22  ;;  %v149_v31 = vmul.f32 %v148_v16, %v148_v16 }
  0x14   :  { %v51_v26 = vsel %vm50_vm1, %v49_v61, %v42_v18  ;;  %v52_v27 = vsel %vm50_vm1, %v235_v3, %v44_v19  ;;  %v54_v28 = vsel %vm50_vm1, %v53_v38, %v240_v4  ;;  %v145_v30 = vmul.f32 %v143_v24, %v143_v24 }
  0x15   :  { %vm58_vm2 = vcmp.lt.f32.partialorder %v57_v62, %v51_v26  ;;  %v156_v32 = vmul.f32 -1.0, %v13_v17  ;;  %v139_v36 = vsub.f32 %v136_v29, %v132_v57  ;;  %v144_v37 = vsub.f32 %v136_v29, %v133_v58 }
  0x16   :  { %v59_v33 = vsel %vm58_vm2, %v57_v62, %v51_v26  ;;  %v61_v35 = vsel %vm58_vm2, %v273_v14, %v52_v27  ;;  %v62_v34 = vsel %vm58_vm2, %v240_v4, %v54_v28  ;;  %v153_v39 = vmul.f32 %v152_v25, %v152_v25 }
  0x17   :  { %vm66_vm3 = vcmp.lt.f32.partialorder %v65_v6, %v59_v33  ;;  %v157_v40 = vadd.f32 %v156_v32, %v131_v8  ;;  %v141_v43 = vadd.f32 %v140_v23, %v139_v36  ;;  %v146_v44 = vadd.f32 %v145_v30, %v144_v37 }
  0x18   :  { %v67_v41 = vsel %vm66_vm3, %v65_v6, %v59_v33  ;;  %v68_v42 = vsel %vm66_vm3, %v235_v3, %v61_v35  ;;  %v70_v38 = vsel %vm66_vm3, %v276_v15, %v62_v34  ;;  %v150_v47 = vadd.f32 %v149_v31, %v139_v36  ;;  %v23_v34 = vld [vmem:[%s353_s0 + $0xf] sm:$0x1] }
  0x19   :  { %vm76_vm4 = vcmp.lt.f32.partialorder %v75_v7, %v67_v41  ;;  %v158_v49 = vsub.f32 %v136_v29, %v134_v22  ;;  %v147_v53 = vmin.f32 %v141_v43, %v146_v44  ;;  %v154_v54 = vadd.f32 %v153_v39, %v144_v37 }
  0x1a   :  { %v77_v50 = vsel %vm76_vm4, %v75_v7, %v67_v41  ;;  %v78_v14 = vsel %vm76_vm4, %v235_v3, %v68_v42  ;;  %v79_v51 = vsel %vm76_vm4, %v240_v4, %v70_v38  ;;  %v81_v52 = vsel %vm76_vm4, %v295_v45, %v245_v5 }
  0x1b   :  { %vm85_vm5 = vcmp.lt.f32.partialorder %v84_v21, %v77_v50  ;;  %v159_v55 = vmul.f32 %v157_v40, %v157_v40  ;;  %v162_v58 = vadd.f32 %v131_v8, %v13_v17  ;;  %v151_v62 = vmin.f32 %v147_v53, %v150_v47 }
  0x1c   :  { %v86_v56 = vsel %vm85_vm5, %v235_v3, %v78_v14  ;;  %v87_v15 = vsel %vm85_vm5, %v240_v4, %v79_v51  ;;  %v89_v57 = vsel %vm85_vm5, %v281_v20, %v81_v52  ;;  %v97_v3 = vadd.f32 %v311_v63, %v302_v48 }
  0x1d   :  { %v90_v59 = vsub.f32 %v220_v0, %v86_v56  ;;  %v91_v60 = vsub.f32 %v225_v1, %v87_v15  ;;  %v92_v61 = vsub.f32 %v230_v2, %v89_v57  ;;  %v160_v6 = vadd.f32 %v159_v55, %v158_v49 }
  0x1e   :  { %v163_v5 = vmul.f32 %v162_v58, %v162_v58  ;;  %v155_v10 = vmin.f32 %v151_v62, %v154_v54  ;;  %v206_v17 = vmov 0.0   ;;  %vm120_vm9 = vcmp.eq.f32.partialorder %v97_v3, 0.0 }
  0x1f   :  { %v98_v45 = vmul.f32 %v90_v59, %v90_v59  ;;  %v99_v7 = vmul.f32 %v91_v60, %v91_v60  ;;  %v101_v9 = vmul.f32 %v92_v61, %v92_v61  ;;  %195 = vst [vmem:[%s354_s1 + $0x2] sm:$0x3f] %v206_v17  ;;  %v103_v18 = vmul.f32 %v90_v59, %v265_v12 }
  0x20   :  { %v164_v11 = vadd.f32 %v163_v5, %v158_v49  ;;  %v161_v20 = vmin.f32 %v155_v10, %v160_v6  ;;  %v104_v19 = vmul.f32 %v91_v60, %v270_v13  ;;  %v106_v24 = vmul.f32 %v92_v61, %v300_v46  ;;  %v24_v49 = vld [vmem:[%s353_s0 + $0x10] sm:$0x1] }
  0x21   :  { %v100_v4 = vadd.f32 %v99_v7, %v98_v45  ;;  %vm189_vm1 = vcmp.eq.f32.partialorder %v23_v34, 1.0  ;;  %vm188_vm2 = vcmp.eq.f32.partialorder %v23_v34, 0.0 }
  0x22   :  { %v165_v16 = vmin.f32 %v161_v20, %v164_v11  ;;  %v105_v23 = vadd.f32 %v104_v19, %v103_v18 }
  0x23   :  { %v102_v8 = vadd.f32 %v101_v9, %v100_v4 }
  0x24   :  { %202 = vrsqrt.f32 %v165_v16  ;;  %v107_v29 = vadd.f32 %v106_v24, %v105_v23  ;;  %vm173_vm11 = vcmp.eq.f32.partialorder %v165_v16, inf  ;;  %v176_v13 = vand.u32 2147483648, %v165_v16 }
  0x25   :  { %v108_v0 = vmul.f32 %v102_v8, %v97_v3  ;;  %vm121_vm10 = vcmp.eq.f32.partialorder %v102_v8, 0.0  ;;  %vm175_vm12 = vcmp.eq.f32.partialorder %v165_v16, 0.0 }
  0x26   :  { %vm122_vm13 = vmor %vm120_vm9, %vm121_vm10 }
  0x27   :  { %204 = vrsqrt.f32 %v108_v0  ;;  %vm115_vm6 = vweird.f32 %v108_v0 }
  0x2a   :  { %v203_v1 = vpop.eup %202 }
  0x2b   :  { %v167_v21 = vmul.f32 %v203_v1, %v165_v16 }
  0x2d   :  { %v205_v2 = vpop.eup %204  ;;  %v168_v63 = vmul.f32 %v203_v1, %v167_v21 }
  0x2e   :  { %v110_v48 = vmul.f32 %v205_v2, %v108_v0  ;;  %vm116_vm7 = vweird.f32 %v205_v2 }
  0x2f   :  { %v169_v25 = vmul.f32 0.5, %v168_v63  ;;  %vm117_vm8 = vmor %vm115_vm6, %vm116_vm7 }
  0x30   :  { %v111_v22 = vmul.f32 %v205_v2, %v110_v48 }
  0x31   :  { %v170_v27 = vsub.f32 1.5, %v169_v25 }
  0x32   :  { %v112_v26 = vmul.f32 0.5, %v111_v22 }
  0x33   :  { %v171_v30 = vmul.f32 %v203_v1, %v170_v27 }
  0x34   :  { %v113_v28 = vsub.f32 1.5, %v112_v26 }
  0x35   :  { %v172_v31 = vmul.f32 %v171_v30, %v165_v16 }
  0x36   :  { %v114_v12 = vmul.f32 %v205_v2, %v113_v28 }
  0x37   :  { %v174_v46 = vsel %vm173_vm11, %v165_v16, %v172_v31 }
  0x38   :  { %v118_v32 = vsel %vm117_vm8, %v205_v2, %v114_v12  ;;  %v177_v35 = vsel %vm175_vm12, %v176_v13, %v174_v46 }
  0x39   :  { %v119_v33 = vmul.f32 %v118_v32, %v107_v29  ;;  %v178_v36 = vsub.f32 3.0, %v177_v35  ;;  %v180_v37 = vsub.f32 1.0, %v177_v35  ;;  %v200_v39 = vadd.f32 -2.5, %v177_v35 }
  0x3a   :  { %vm185_vm0 = vcmp.gt.f32.partialorder %v177_v35, 0.01  ;;  %v186_v40 = vmul.f32 1.5, %v177_v35 }
  0x3b   :  { %vm123_vm14 = vcmp.ne.f32.partialorder %v119_v33, %v119_v33  ;;  %v181_v42 = vmax.f32 %v180_v37, 0.0  ;;  %v183_v38 = vmax.f32 %v200_v39, 0.0  ;;  %v179_v43 = vmax.f32 %v178_v36, 0.0 }
  0x3c   :  { %vm124_vm15 = vmor %vm122_vm13, %vm123_vm14  ;;  %v187_v44 = vsel %vm185_vm0, %v186_v40, 0.0 }
  0x3d   :  { %v125_v41 = vsel %vm124_vm15, 1.0, %v119_v33  ;;  %v184_v47 = vadd.f32 %v183_v38, %v181_v42 }
  0x3e   :  { %193 = vst [vmem:[%s354_s1] sm:$0x1] %v125_v41 }
  0x3f   :  { %v190_v50 = vsel %vm189_vm1, %v184_v47, %v187_v44 }
  0x40   :  { %v191_v14 = vsel %vm188_vm2, %v179_v43, %v190_v50 }
  0x41   :  { %v192_v51 = vmul.f32 %v191_v14, %v24_v49 }
  0x43   :  { %194 = vst [vmem:[%s354_s1 + $0x1] sm:$0x1] %v192_v51 }

</bundles_post_ra>
